<compile_context>
chip_gen: v7x
topology: tpu7x:2x2x1
jax: 0.10.0
libtpu: 0.0.40
codegen_flags: <defaults>
</compile_context>

<pallas_src>
import jax
import jax.numpy as jnp
from jax.experimental import pallas as pl
from jax.experimental.pallas import tpu as pltpu

LANE = 128


def _round_up(x: int, m: int) -> int:
    return ((x + m - 1) // m) * m


def _cdiv(a: int, b: int) -> int:
    return (a + b - 1) // b


def _mlp_readout_kernel(x_ref, w1_ref, b1_ref, w2_ref, b2_ref, w3_ref, b3_ref, o_ref):
    # Cast x to the compute dtype in-kernel (no wrapper-side pad/cast pass over x).
    x = x_ref[...].astype(w1_ref.dtype)

    # Layer 1: Linear + ReLU.  MXU matmul, f32 accumulation; bias/ReLU on the VPU.
    h = jnp.dot(x, w1_ref[...], preferred_element_type=jnp.float32)
    h = jnp.maximum(h + b1_ref[...], 0.0).astype(w2_ref.dtype)  # explicit bf16 hand-off

    # Layer 2: Linear + ReLU.
    h = jnp.dot(h, w2_ref[...], preferred_element_type=jnp.float32)
    h = jnp.maximum(h + b2_ref[...], 0.0).astype(w3_ref.dtype)

    # Layer 3: Linear (no activation) — readout logits.
    y = jnp.dot(h, w3_ref[...], preferred_element_type=jnp.float32)
    y = y + b3_ref[...]

    o_ref[...] = y.astype(o_ref.dtype)


def prepare_mlp_readout_params(params, compute_dtype=jnp.bfloat16):
    """One-time setup: pad hidden/output feature dims to 128 lanes and cast weights.

    params: [(W1, b1), (W2, b2), (W3, b3)] with W stored as (in, out).
    Zero padding is semantics-preserving: padded output cols get bias 0 ->
    relu(0)=0 -> zero contribution to the next layer's padded K rows.
    """
    (w1, b1), (w2, b2), (w3, b3) = params
    D0, H1 = w1.shape
    H2, OUT = w2.shape[1], w3.shape[1]
    assert w2.shape[0] == H1 and w3.shape[0] == H2
    H1p, H2p, OUTp = (_round_up(d, LANE) for d in (H1, H2, OUT))

    def pad2(a, rows, cols, dtype):
        a = a.astype(dtype)
        return jnp.pad(a, ((0, rows - a.shape[0]), (0, cols - a.shape[1])))

    return dict(
        D0=D0, OUT=OUT,
        w1=pad2(w1, D0, H1p, compute_dtype),              # K dim stays D0: matches un-padded x
        b1=pad2(b1.reshape(1, -1), 1, H1p, jnp.float32),
        w2=pad2(w2, H1p, H2p, compute_dtype),
        b2=pad2(b2.reshape(1, -1), 1, H2p, jnp.float32),
        w3=pad2(w3, H2p, OUTp, compute_dtype),
        b3=pad2(b3.reshape(1, -1), 1, OUTp, jnp.float32),
    )


def mlp_readout(x, prepared, *, tile_b=1024, out_dtype=None):
    """Fused MLPReadout forward.  x: (batch, input_dim) in its native dtype."""
    w1, b1 = prepared["w1"], prepared["b1"]
    w2, b2 = prepared["w2"], prepared["b2"]
    w3, b3 = prepared["w3"], prepared["b3"]
    OUT = prepared["OUT"]

    B, D0 = x.shape
    assert D0 == prepared["D0"]
    H1p, H2p, OUTp = w1.shape[1], w2.shape[1], w3.shape[1]

    if out_dtype is None:
        out_dtype = w1.dtype  # default to compute dtype: halves output HBM writeback

    # Batch tile: multiple of 16 (sublane packing for bf16 intermediates/output).
    # Aim for >=2 grid steps so the "parallel" axis feeds both TCs on v7x; cap at
    # tile_b so v6e/v5e still get large tiles that amortize per-step overhead.
    tb = max(16, min(tile_b, _round_up(_cdiv(B, 2), 16)))
    grid = (_cdiv(B, tb),)  # no batch padding; ragged last tile is masked on store

    csize = jnp.dtype(w1.dtype).itemsize
    xsize = jnp.dtype(x.dtype).itemsize
    osize = jnp.dtype(out_dtype).itemsize
    vmem_bytes = int(
        2 * tb * D0 * xsize                                    # double-buffered x tiles
        + 2 * tb * OUTp * osize                                # double-buffered out tiles
        + 2 * (D0 * H1p + H1p * H2p + H2p * OUTp) * csize      # resident weights (2 bufs)
        + 2 * (H1p + H2p + OUTp) * 4                           # resident biases (f32)
        + tb * (H1p + H2p + OUTp) * (4 + csize)                # f32 acc + bf16 intermediates
        + (4 << 20)                                            # headroom
    )
    try:
        vmem_cap = int(pltpu.get_tpu_info().vmem_capacity_bytes)
    except Exception:
        vmem_cap = 64 << 20  # conservative fallback (v7x per-TC VMEM)
    vmem_bytes = min(max(vmem_bytes, 16 << 20), vmem_cap)

    out = pl.pallas_call(
        _mlp_readout_kernel,
        out_shape=jax.ShapeDtypeStruct((B, OUTp), out_dtype),
        grid_spec=pltpu.PrefetchScalarGridSpec(
            num_scalar_prefetch=0,
            grid=grid,
            in_specs=[
                pl.BlockSpec((tb, D0), lambda i: (i, 0)),     # x: streams per batch tile
                pl.BlockSpec((D0, H1p), lambda i: (0, 0)),    # W1: VMEM-resident (fetched once)
                pl.BlockSpec((1, H1p), lambda i: (0, 0)),     # b1
                pl.BlockSpec((H1p, H2p), lambda i: (0, 0)),   # W2
                pl.BlockSpec((1, H2p), lambda i: (0, 0)),     # b2
                pl.BlockSpec((H2p, OUTp), lambda i: (0, 0)),  # W3
                pl.BlockSpec((1, OUTp), lambda i: (0, 0)),    # b3
            ],
            out_specs=pl.BlockSpec((tb, OUTp), lambda i: (i, 0)),
        ),
        compiler_params=pltpu.CompilerParams(
            dimension_semantics=("parallel",),
            vmem_limit_bytes=vmem_bytes,
        ),
    )(x, w1, b1, w2, b2, w3, b3)

    # Trim only the lane padding of the logits (no batch padding was added).
    return out[:, :OUT]


def _reference(x, params):
    y = x
    for l, (w, b) in enumerate(params):
        y = y @ w + b
        if l < len(params) - 1:
            y = jnp.maximum(y, 0.0)
    return y


if __name__ == "__main__":
    key = jax.random.PRNGKey(0)
    batch, input_dim, output_dim = 10, 64, 7   # small; batch deliberately not a tile multiple
    dims = [input_dim, input_dim // 2, input_dim // 4, output_dim]

    keys = jax.random.split(key, 1 + 2 * 3)
    x = jax.random.normal(keys[0], (batch, input_dim), dtype=jnp.float32)

    params = []
    for l in range(3):
        w = jax.random.normal(keys[1 + 2 * l], (dims[l], dims[l + 1]), jnp.float32) / jnp.sqrt(dims[l])
        b = 0.01 * jax.random.normal(keys[2 + 2 * l], (dims[l + 1],), jnp.float32)
        params.append((w, b))

    prepared = prepare_mlp_readout_params(params)          # one-time pad + cast
    y = mlp_readout(x, prepared)
    y = jax.block_until_ready(y)

    ref = _reference(x, params)
    max_err = float(jnp.max(jnp.abs(y.astype(jnp.float32) - ref)))
    assert y.shape == (batch, output_dim), y.shape
    # bf16 MXU inputs + bf16 inter-layer hand-off + bf16 output vs f32 reference.
    assert max_err < 8e-2, f"max abs error too large: {max_err}"

    print("KERNEL_OK")
</pallas_src>

<mosaic_0001>
module attributes {stable_mosaic.version = 11 : i64} {
  func.func @_mlp_readout_kernel(%arg0: i32, %arg1: memref<16x64xf32, #tpu.memory_space<vmem>>, %arg2: memref<64x128xbf16, #tpu.memory_space<vmem>>, %arg3: memref<1x128xf32, #tpu.memory_space<vmem>>, %arg4: memref<128x128xbf16, #tpu.memory_space<vmem>>, %arg5: memref<1x128xf32, #tpu.memory_space<vmem>>, %arg6: memref<128x128xbf16, #tpu.memory_space<vmem>>, %arg7: memref<1x128xf32, #tpu.memory_space<vmem>>, %arg8: memref<16x128xbf16, #tpu.memory_space<vmem>>) attributes {dimension_semantics = [#tpu.dimension_semantics<parallel>], iteration_bounds = array<i64: 1>, scalar_prefetch = 0 : i64, scratch_operands = 0 : i64, tpu.core_type = #tpu.core_type<tc>, window_params = [{transform_indices = @transform_0, window_bounds = array<i64: 16, 64>}, {pipeline_mode = #tpu.pipeline_mode<synchronous>, transform_indices = @transform_1, window_bounds = array<i64: 64, 128>}, {pipeline_mode = #tpu.pipeline_mode<synchronous>, transform_indices = @transform_2, window_bounds = array<i64: 1, 128>}, {pipeline_mode = #tpu.pipeline_mode<synchronous>, transform_indices = @transform_3, window_bounds = array<i64: 128, 128>}, {pipeline_mode = #tpu.pipeline_mode<synchronous>, transform_indices = @transform_4, window_bounds = array<i64: 1, 128>}, {pipeline_mode = #tpu.pipeline_mode<synchronous>, transform_indices = @transform_5, window_bounds = array<i64: 128, 128>}, {pipeline_mode = #tpu.pipeline_mode<synchronous>, transform_indices = @transform_6, window_bounds = array<i64: 1, 128>}, {transform_indices = @transform_7, window_bounds = array<i64: 16, 128>}]} {
    %c0 = arith.constant 0 : index
    %c0_0 = arith.constant 0 : index
    %0 = vector.load %arg1[%c0, %c0_0] : memref<16x64xf32, #tpu.memory_space<vmem>>, vector<16x64xf32>
    %1 = arith.truncf %0 : vector<16x64xf32> to vector<16x64xbf16>
    %c0_1 = arith.constant 0 : index
    %c0_2 = arith.constant 0 : index
    %2 = vector.load %arg2[%c0_1, %c0_2] : memref<64x128xbf16, #tpu.memory_space<vmem>>, vector<64x128xbf16>
    %cst = arith.constant dense<0.000000e+00> : vector<16x128xf32>
    %3 = tpu.matmul %1, %2, %cst {dimension_numbers = #tpu.dot_dimension_numbers<[1], [0], [0], [1], [0, 0, 1, 1], [], []>} : vector<16x64xbf16>, vector<64x128xbf16>, vector<16x128xf32> -> vector<16x128xf32>
    %c0_3 = arith.constant 0 : index
    %c0_4 = arith.constant 0 : index
    %4 = vector.load %arg3[%c0_3, %c0_4] : memref<1x128xf32, #tpu.memory_space<vmem>>, vector<1x128xf32>
    %5 = vector.broadcast %4 : vector<1x128xf32> to vector<16x128xf32>
    %6 = arith.addf %3, %5 : vector<16x128xf32>
    %cst_5 = arith.constant 0.000000e+00 : f32
    %7 = vector.broadcast %cst_5 : f32 to vector<16x128xf32>
    %8 = arith.maximumf %6, %7 : vector<16x128xf32>
    %9 = arith.truncf %8 : vector<16x128xf32> to vector<16x128xbf16>
    %c0_6 = arith.constant 0 : index
    %c0_7 = arith.constant 0 : index
    %10 = vector.load %arg4[%c0_6, %c0_7] : memref<128x128xbf16, #tpu.memory_space<vmem>>, vector<128x128xbf16>
    %cst_8 = arith.constant dense<0.000000e+00> : vector<16x128xf32>
    %11 = tpu.matmul %9, %10, %cst_8 {dimension_numbers = #tpu.dot_dimension_numbers<[1], [0], [0], [1], [0, 0, 1, 1], [], []>} : vector<16x128xbf16>, vector<128x128xbf16>, vector<16x128xf32> -> vector<16x128xf32>
    %c0_9 = arith.constant 0 : index
    %c0_10 = arith.constant 0 : index
    %12 = vector.load %arg5[%c0_9, %c0_10] : memref<1x128xf32, #tpu.memory_space<vmem>>, vector<1x128xf32>
    %13 = vector.broadcast %12 : vector<1x128xf32> to vector<16x128xf32>
    %14 = arith.addf %11, %13 : vector<16x128xf32>
    %cst_11 = arith.constant 0.000000e+00 : f32
    %15 = vector.broadcast %cst_11 : f32 to vector<16x128xf32>
    %16 = arith.maximumf %14, %15 : vector<16x128xf32>
    %17 = arith.truncf %16 : vector<16x128xf32> to vector<16x128xbf16>
    %c0_12 = arith.constant 0 : index
    %c0_13 = arith.constant 0 : index
    %18 = vector.load %arg6[%c0_12, %c0_13] : memref<128x128xbf16, #tpu.memory_space<vmem>>, vector<128x128xbf16>
    %cst_14 = arith.constant dense<0.000000e+00> : vector<16x128xf32>
    %19 = tpu.matmul %17, %18, %cst_14 {dimension_numbers = #tpu.dot_dimension_numbers<[1], [0], [0], [1], [0, 0, 1, 1], [], []>} : vector<16x128xbf16>, vector<128x128xbf16>, vector<16x128xf32> -> vector<16x128xf32>
    %c0_15 = arith.constant 0 : index
    %c0_16 = arith.constant 0 : index
    %20 = vector.load %arg7[%c0_15, %c0_16] : memref<1x128xf32, #tpu.memory_space<vmem>>, vector<1x128xf32>
    %21 = vector.broadcast %20 : vector<1x128xf32> to vector<16x128xf32>
    %22 = arith.addf %19, %21 : vector<16x128xf32>
    %23 = arith.truncf %22 : vector<16x128xf32> to vector<16x128xbf16>
    %c0_17 = arith.constant 0 : index
    %c0_18 = arith.constant 0 : index
    %24 = vector.load %arg8[%c0_17, %c0_18] : memref<16x128xbf16, #tpu.memory_space<vmem>>, vector<16x128xbf16>
    tpu.vector_store %arg8[%c0_17, %c0_18], %23 {strides = array<i32>} : memref<16x128xbf16, #tpu.memory_space<vmem>>, vector<16x128xbf16>,
    return
  }
  func.func @transform_0(%arg0: i32) -> (i32, i32) {
    %c0_i32 = arith.constant 0 : i32
    %c0_i32_0 = arith.constant 0 : i32
    return %arg0, %c0_i32 : i32, i32
  }
  func.func @transform_1(%arg0: i32) -> (i32, i32) {
    %c0_i32 = arith.constant 0 : i32
    %c0_i32_0 = arith.constant 0 : i32
    %c0_i32_1 = arith.constant 0 : i32
    return %c0_i32, %c0_i32_0 : i32, i32
  }
  func.func @transform_2(%arg0: i32) -> (i32, i32) {
    %c0_i32 = arith.constant 0 : i32
    %c0_i32_0 = arith.constant 0 : i32
    %c0_i32_1 = arith.constant 0 : i32
    return %c0_i32, %c0_i32_0 : i32, i32
  }
  func.func @transform_3(%arg0: i32) -> (i32, i32) {
    %c0_i32 = arith.constant 0 : i32
    %c0_i32_0 = arith.constant 0 : i32
    %c0_i32_1 = arith.constant 0 : i32
    return %c0_i32, %c0_i32_0 : i32, i32
  }
  func.func @transform_4(%arg0: i32) -> (i32, i32) {
    %c0_i32 = arith.constant 0 : i32
    %c0_i32_0 = arith.constant 0 : i32
    %c0_i32_1 = arith.constant 0 : i32
    return %c0_i32, %c0_i32_0 : i32, i32
  }
  func.func @transform_5(%arg0: i32) -> (i32, i32) {
    %c0_i32 = arith.constant 0 : i32
    %c0_i32_0 = arith.constant 0 : i32
    %c0_i32_1 = arith.constant 0 : i32
    return %c0_i32, %c0_i32_0 : i32, i32
  }
  func.func @transform_6(%arg0: i32) -> (i32, i32) {
    %c0_i32 = arith.constant 0 : i32
    %c0_i32_0 = arith.constant 0 : i32
    %c0_i32_1 = arith.constant 0 : i32
    return %c0_i32, %c0_i32_0 : i32, i32
  }
  func.func @transform_7(%arg0: i32) -> (i32, i32) {
    %c0_i32 = arith.constant 0 : i32
    %c0_i32_0 = arith.constant 0 : i32
    return %arg0, %c0_i32 : i32, i32
  }
}

</mosaic_0001>

<bundles_post_ra>
// kernel: tpu_custom_call.1
= control target key start
LH: loop header
LB: loop body
LE: loop exit
PB: predicated region body
PF: predicated region fallthrough
CT: control target
= control target key end

     0   :  { %12 = vsyncpa [#allocation3], 0  ;;  %s851_s0 = inlined_call_operand.hbm [shape: f32[10,64], index: 0, kind: input, shape index: {}]   ;;  %s852_s1 = inlined_call_operand.hbm [shape: bf16[64,128], index: 1, kind: input, shape index: {}]   ;;  %s853_s2 = inlined_call_operand.vmem [shape: f32[1,128], index: 2, kind: input, shape index: {}]   ;;  %s854_s3 = inlined_call_operand.hbm [shape: bf16[128,128], index: 3, kind: input, shape index: {}]   ;;  %s855_s4 = inlined_call_operand.vmem [shape: f32[1,128], index: 4, kind: input, shape index: {}]   ;;  %s856_s5 = inlined_call_operand.hbm [shape: bf16[128,128], index: 5, kind: input, shape index: {}]   ;;  %s857_s6 = inlined_call_operand.vmem [shape: f32[1,128], index: 6, kind: input, shape index: {}]   ;;  %s858_s7 = inlined_call_operand.hbm [shape: bf16[10,128], index: 7, kind: output, shape index: {}]  }
   0x1   :  { %13 = vsyncpa [#allocation6], 0 }
   0x2   :  { %14 = vsyncpa [#allocation9], 0 }
   0x3   :  { %15 = vsyncpa [#allocation4], 0  ;;  %s686_s24 = smov [#allocation5]   ;;  %s568_s28 = scalar_lea.hbm %s852_s1, 512 }
   0x4   :  { %s33_s25 = sshll.u32 %s686_s24, 4  ;;  %p569_p0 = scmp.ne.s32.totalorder %s852_s1, %s568_s28  ;;  %s34_s25 = int_to_ptr.vmem [resolvable:$true] %s33_s25 }
   0x5   :  { %p572_p1 = scmp.lt.u32.totalorder %s568_s28, %s852_s1 }
   0x7   :  { %p574_p2 = pnand %p572_p1, %p569_p0 }
   0x9   :  { %577 = shalt.err (!%p574_p2)
}
   0xa   :  { %s578_s10 = scalar_lea.vmem %s34_s25, 512  ;;  %p583_p4 = scmp.lt.s32.totalorder %s34_s25, %s34_s25 }
   0xb   :  { %p579_p3 = scmp.ne.s32.totalorder %s34_s25, %s578_s10  ;;  %p584_p5 = scmp.lt.s32.totalorder %s578_s10, %s578_s10 }
   0xd   :  { %p585_p6 = por %p584_p5, %p583_p4 }
   0xf   :  { %p586_p7 = pnand %p585_p6, %p579_p3 }
  0x11   :  { %589 = shalt.err (!%p586_p7)
}
  0x12   :  { %s687_s11 = smov 64   ;;  %s688_s12 = smov 4  }
  0x13   :  { %39 = dma.hbm_to_vmem [thread:$0]  %s852_s1, 512, %s34_s25, [#allocation6], %s687_s11, %s687_s11, %s688_s12  }
  0x14   :  { %s689_s15 = smov [#allocation2]   ;;  %s590_s19 = scalar_lea.hbm %s851_s0, 256 }
  0x15   :  { %s21_s16 = sshll.u32 %s689_s15, 4  ;;  %p591_p8 = scmp.ne.s32.totalorder %s851_s0, %s590_s19  ;;  %s22_s16 = int_to_ptr.vmem [resolvable:$true] %s21_s16 }
  0x16   :  { %p594_p9 = scmp.lt.u32.totalorder %s590_s19, %s851_s0 }
  0x18   :  { %p596_p10 = pnand %p594_p9, %p591_p8 }
  0x1a   :  { %599 = shalt.err (!%p596_p10)
}
  0x1b   :  { %s600_s24 = scalar_lea.vmem %s22_s16, 256  ;;  %p605_p12 = scmp.lt.s32.totalorder %s22_s16, %s22_s16 }
  0x1c   :  { %p601_p11 = scmp.ne.s32.totalorder %s22_s16, %s600_s24  ;;  %p606_p13 = scmp.lt.s32.totalorder %s600_s24, %s600_s24 }
  0x1e   :  { %p607_p0 = por %p606_p13, %p605_p12 }
  0x20   :  { %p608_p1 = pnand %p607_p0, %p601_p11 }
  0x22   :  { %611 = shalt.err (!%p608_p1)
}
  0x23   :  { %s690_s1 = smov 128   ;;  %s691_s25 = smov 8  }
  0x24   :  { %27 = dma.hbm_to_vmem [thread:$0]  %s851_s0, 256, %s22_s16, [#allocation3], %s690_s1, %s690_s1, %s691_s25  }
  0x25   :  { %s692_s28 = smov [#allocation7]   ;;  %s693_s30 = smov [#allocation8]  }
  0x26   :  { %s47_s29 = sshll.u32 %s692_s28, 4  ;;  %s61_s8 = sshll.u32 %s693_s30, 4  ;;  %s48_s29 = int_to_ptr.vmem [resolvable:$true] %s47_s29  ;;  %s764_s8 = int_to_ptr.vmem [resolvable:$true] %s61_s8 }
  0x27   :  { %s612_s13 = scalar_lea.hbm %s854_s3, 1024 }
  0x28   :  { %p613_p2 = scmp.ne.s32.totalorder %s854_s3, %s612_s13  ;;  %p616_p3 = scmp.lt.u32.totalorder %s612_s13, %s854_s3 }
  0x2a   :  { %p618_p4 = pnand %p616_p3, %p613_p2 }
  0x2c   :  { %621 = shalt.err (!%p618_p4)
}
  0x2d   :  { %s622_s0 = scalar_lea.vmem %s48_s29, 1024  ;;  %p627_p6 = scmp.lt.s32.totalorder %s48_s29, %s48_s29 }
  0x2e   :  { %p623_p5 = scmp.ne.s32.totalorder %s48_s29, %s622_s0  ;;  %p628_p7 = scmp.lt.s32.totalorder %s622_s0, %s622_s0 }
  0x30   :  { %p629_p8 = por %p628_p7, %p627_p6 }
  0x32   :  { %p630_p9 = pnand %p629_p8, %p623_p5 }
  0x34   :  { %633 = shalt.err (!%p630_p9)
}
  0x35   :  { %53 = dma.hbm_to_vmem [thread:$0]  %s854_s3, 1024, %s48_s29, [#allocation6], %s687_s11, %s687_s11, %s688_s12  }
  0x36   :  { %s634_s22 = scalar_lea.hbm %s856_s5, 1024 }
  0x37   :  { %p635_p10 = scmp.ne.s32.totalorder %s856_s5, %s634_s22  ;;  %p638_p11 = scmp.lt.u32.totalorder %s634_s22, %s856_s5 }
  0x39   :  { %p640_p12 = pnand %p638_p11, %p635_p10 }
  0x3b   :  { %643 = shalt.err (!%p640_p12)
}
  0x3c   :  { %s644_s26 = scalar_lea.vmem %s764_s8, 1024  ;;  %p649_p0 = scmp.lt.s32.totalorder %s764_s8, %s764_s8 }
  0x3d   :  { %p645_p13 = scmp.ne.s32.totalorder %s764_s8, %s644_s26  ;;  %p650_p1 = scmp.lt.s32.totalorder %s644_s26, %s644_s26 }
  0x3f   :  { %p651_p2 = por %p650_p1, %p649_p0 }
  0x41   :  { %p652_p3 = pnand %p651_p2, %p645_p13 }
  0x43   :  { %655 = shalt.err (!%p652_p3)
}
  0x44   :  { %67 = dma.hbm_to_vmem [thread:$0]  %s856_s5, 1024, %s764_s8, [#allocation9], %s687_s11, %s687_s11, %s688_s12  }
  0x45   :  { %678 = dma.done.wait [#allocation3], 256  }
  0x46   :  { %679 = vsyncadd [#allocation3], 4294967040 }
  0x47   :  { %680 = dma.done.wait [#allocation6], 1536  }
  0x48   :  { %681 = vsyncadd [#allocation6], 4294965760 }
  0x49   :  { %682 = dma.done.wait [#allocation9], 1024  }
  0x4a   :  { %683 = vsyncadd [#allocation9], 4294966272  ;;  %v694_v0 = vmov 0.0   ;;  %vm695_vm0 = vmmov 0   ;;  %v548_v1 = vld [vmem:[#allocation5] sm:$0xff]   ;;  %v549_v2 = vld [vmem:[#allocation5 + $0x8] sm:$0xff]  }
  0x4b   :  { %485 = vmatprep.subr.bf16.mxu0 %v694_v0  ;;  %493 = vmatprep.mubr.msk.bf16.mxu0 %vm695_vm0, %v694_v0  ;;  %v552_v3 = vld [vmem:[#allocation7] sm:$0xff]   ;;  %v550_v4 = vld [vmem:[#allocation5 + $0x10] sm:$0xff]   ;;  %v553_v5 = vld [vmem:[#allocation7 + $0x8] sm:$0xff]   ;;  %vm125_vm1 = vcmask 523264   ;;  %s696_s9 = smov [#allocation10]  }
  0x4c   :  { %497 = vmatprep.subr.bf16.mxu1 %v694_v0  ;;  %513 = vmatprep.mubr.msk.bf16.mxu1 %vm695_vm0, %v694_v0  ;;  %v551_v6 = vld [vmem:[#allocation5 + $0x18] sm:$0xff]   ;;  %v83_v7 = vld [vmem:[#allocation2] sm:$0xff]  ;;  %v556_v12 = vld [vmem:[#allocation7 + $0x20] sm:$0xff]   ;;  %s415_s10 = sshll.u32 %s696_s9, 4  ;;  %s416_s10 = int_to_ptr.vmem [resolvable:$true] %s415_s10 }
  0x4d   :  { %486 = vmatpush3.bf16.msra.mxu0 %v548_v1  ;;  %498 = vmatpush3.bf16.msra.mxu1 %v552_v3  ;;  %v84_v8 = vld [vmem:[#allocation2 + $0x8] sm:$0xff]  ;;  %v554_v9 = vld [vmem:[#allocation7 + $0x10] sm:$0xff]   ;;  %v557_v13 = vld [vmem:[#allocation7 + $0x28] sm:$0xff]   ;;  %p661_p5 = scmp.lt.s32.totalorder %s416_s10, %s416_s10 }
  0x4e   :  { %487 = vmatprep.subr.bf16.mxu0 %v694_v0  ;;  %499 = vmatprep.subr.bf16.mxu1 %v694_v0  ;;  %v85_v10 = vpack.c.bf16 %v84_v8, %v83_v7  ;;  %v555_v11 = vld [vmem:[#allocation7 + $0x18] sm:$0xff]   ;;  %v558_v14 = vld [vmem:[#allocation7 + $0x30] sm:$0xff]   ;;  %v560_v16 = vld [vmem:[#allocation8] sm:$0xff]  }
  0x4f   :  { %v559_v15 = vld [vmem:[#allocation7 + $0x38] sm:$0xff]   ;;  %v561_v17 = vld [vmem:[#allocation8 + $0x8] sm:$0xff]   ;;  %v562_v18 = vld [vmem:[#allocation8 + $0x10] sm:$0xff]  }
  0x50   :  { %v563_v19 = vld [vmem:[#allocation8 + $0x18] sm:$0xff]   ;;  %v564_v20 = vld [vmem:[#allocation8 + $0x20] sm:$0xff]   ;;  %v565_v21 = vld [vmem:[#allocation8 + $0x28] sm:$0xff]  }
  0x51   :  { %488 = vmatpush3.bf16.msra.mxu0 %v549_v2  ;;  %500 = vmatpush3.bf16.msra.mxu1 %v553_v5  ;;  %v429_v22 = vld [vmem:[%s853_s2] ss:$0 sm:$0xff]  ;;  %v567_v33 = vld [vmem:[#allocation8 + $0x38] sm:$0xff]  }
  0x52   :  { %489 = vmatprep.subr.bf16.mxu0 %v694_v0  ;;  %501 = vmatprep.subr.bf16.mxu1 %v694_v0  ;;  %v566_v32 = vld [vmem:[#allocation8 + $0x30] sm:$0xff]  }
  0x53   :  { %v435_v34 = vld [vmem:[%s855_s4] ss:$0 sm:$0xff]  ;;  %s656_s4 = scalar_lea.vmem %s416_s10, 128 }
  0x54   :  { %v444_v44 = vld [vmem:[%s857_s6] ss:$0 sm:$0xff]  ;;  %p657_p4 = scmp.ne.s32.totalorder %s416_s10, %s656_s4  ;;  %p662_p6 = scmp.lt.s32.totalorder %s656_s4, %s656_s4 }
  0x55   :  { %490 = vmatpush3.bf16.msra.mxu0 %v550_v4  ;;  %502 = vmatpush3.bf16.msra.mxu1 %v554_v9 }
  0x56   :  { %491 = vmatprep.subr.bf16.mxu0 %v694_v0  ;;  %503 = vmatprep.subr.bf16.mxu1 %v694_v0  ;;  %p663_p7 = por %p662_p6, %p661_p5 }
  0x58   :  { %p664_p8 = pnand %p663_p7, %p657_p4 }
  0x59   :  { %492 = vmatpush3.bf16.msra.mxu0 %v551_v6  ;;  %504 = vmatpush3.bf16.msra.mxu1 %v555_v11 }
  0x5a   :  { %517 = vmatprep.subr.bf16.mxu0 %v694_v0  ;;  %505 = vmatprep.subr.bf16.mxu1 %v694_v0 }
  0x5c   :  { %494 = vmatmul.mubr.msk.bf16.vlgmr.msra.gmra.mrb[0].mxu0 %vm125_vm1, %v85_v10 }
  0x5d   :  { %533 = vmatprep.mubr.msk.bf16.mxu0 %vm695_vm0, %v694_v0  ;;  %506 = vmatpush3.bf16.msra.mxu1 %v556_v12 }
  0x5e   :  { %507 = vmatprep.subr.bf16.mxu1 %v694_v0  ;;  %518 = vmatpush3.bf16.msra.mxu0 %v560_v16 }
  0x5f   :  { %519 = vmatprep.subr.bf16.mxu0 %v694_v0 }
  0x61   :  { %508 = vmatpush3.bf16.msra.mxu1 %v557_v13 }
  0x62   :  { %509 = vmatprep.subr.bf16.mxu1 %v694_v0  ;;  %520 = vmatpush3.bf16.msra.mxu0 %v561_v17 }
  0x63   :  { %521 = vmatprep.subr.bf16.mxu0 %v694_v0 }
  0x65   :  { %510 = vmatpush3.bf16.msra.mxu1 %v558_v14 }
  0x66   :  { %511 = vmatprep.subr.bf16.mxu1 %v694_v0  ;;  %522 = vmatpush3.bf16.msra.mxu0 %v562_v18 }
  0x67   :  { %523 = vmatprep.subr.bf16.mxu0 %v694_v0 }
  0x69   :  { %512 = vmatpush3.bf16.msra.mxu1 %v559_v15 }
  0x6a   :  { %524 = vmatpush3.bf16.msra.mxu0 %v563_v19 }
  0x6b   :  { %525 = vmatprep.subr.bf16.mxu0 %v694_v0 }
  0x6e   :  { %526 = vmatpush3.bf16.msra.mxu0 %v564_v20 }
  0x6f   :  { %527 = vmatprep.subr.bf16.mxu0 %v694_v0 }
  0x72   :  { %528 = vmatpush3.bf16.msra.mxu0 %v565_v21 }
  0x73   :  { %529 = vmatprep.subr.bf16.mxu0 %v694_v0 }
  0x76   :  { %530 = vmatpush3.bf16.msra.mxu0 %v566_v32 }
  0x77   :  { %531 = vmatprep.subr.bf16.mxu0 %v694_v0 }
  0x7a   :  { %532 = vmatpush3.bf16.msra.mxu0 %v567_v33 }
 0x12f   :  { %v163_v23 = vpop.f32.mrb[0].mxu0 }
 0x130   :  { %v164_v24 = vadd.f32 %v429_v22, %v163_v23  ;;  %v495_v25 = vpop.f32.mrb[1].mxu0 }
 0x131   :  { %v166_v26 = vpop.f32.mrb[2].mxu0 }
 0x132   :  { %v167_v27 = vadd.f32 %v429_v22, %v166_v26  ;;  %v496_v28 = vpop.f32.mrb[3].mxu0  ;;  %v170_v29 = vmax.f32 %v164_v24, 0.0 }
 0x134   :  { %v171_v30 = vmax.f32 %v167_v27, 0.0 }
 0x136   :  { %v172_v31 = vpack.c.bf16 %v171_v30, %v170_v29 }
 0x138   :  { %514 = vmatmul.mubr.bf16.vlgmr.msra.gmra.mrb[0].mxu1 %v172_v31 }
 0x20b   :  { %v278_v35 = vpop.f32.mrb[0].mxu1 }
 0x20c   :  { %v279_v36 = vadd.f32 %v435_v34, %v278_v35  ;;  %v515_v37 = vpop.f32.mrb[1].mxu1 }
 0x20d   :  { %v281_v38 = vpop.f32.mrb[2].mxu1 }
 0x20e   :  { %v282_v39 = vadd.f32 %v435_v34, %v281_v38  ;;  %v516_v40 = vpop.f32.mrb[3].mxu1  ;;  %v285_v41 = vmax.f32 %v279_v36, 0.0 }
 0x210   :  { %v286_v42 = vmax.f32 %v282_v39, 0.0 }
 0x212   :  { %v287_v43 = vpack.c.bf16 %v286_v42, %v285_v41 }
 0x214   :  { %534 = vmatmul.mubr.bf16.vlgmr.msra.gmra.mrb[4].mxu0 %v287_v43 }
 0x2e7   :  { %v393_v45 = vpop.f32.mrb[4].mxu0 }
 0x2e8   :  { %v535_v46 = vpop.f32.mrb[5].mxu0  ;;  %v394_v48 = vadd.f32 %v444_v44, %v393_v45 }
 0x2e9   :  { %v396_v47 = vpop.f32.mrb[6].mxu0 }
 0x2ea   :  { %v397_v49 = vadd.f32 %v444_v44, %v396_v47  ;;  %v536_v50 = vpop.f32.mrb[7].mxu0 }
 0x2ec   :  { %v460_v51 = vpack.c.bf16 %v397_v49, %v394_v48 }
 0x2ee   :  { %461 = vst [vmem:[#allocation10] sm:$0xff] %v460_v51  }
 0x2ef   :  { %667 = shalt.err (!%p664_p8)
}
 0x2f0   :  { %s668_s14 = scalar_lea.hbm %s858_s7, 128 }
 0x2f1   :  { %p669_p9 = scmp.ne.s32.totalorder %s858_s7, %s668_s14  ;;  %p672_p10 = scmp.lt.u32.totalorder %s668_s14, %s858_s7 }
 0x2f3   :  { %p674_p11 = pnand %p672_p10, %p669_p9 }
 0x2f5   :  { %677 = shalt.err (!%p674_p11)
}
 0x2f6   :  { %421 = dma.vmem_to_hbm [thread:$0]  %s416_s10, 128, %s858_s7, [#allocation4], %s687_s11, %s687_s11, %s688_s12  }
 0x2f7   :  { %684 = dma.done.wait [#allocation4], 128  }
 0x2f8   :  { %685 = vsyncadd [#allocation4], 4294967168 }
 0x2f9   :  { %425 = vsyncpa [#allocation3], 1 }
 0x2fa   :  { %426 = vsyncpa [#allocation6], 1 }
 0x2fb   :  { %427 = vsyncpa [#allocation9], 1 }
 0x2fc   :  { %428 = vsyncpa [#allocation4], 1 }

</bundles_post_ra>
